<compile_context>
chip_gen: v5e
topology: v5e:2x2
jax: 0.10.0
libtpu: 0.0.40
codegen_flags: <defaults>
</compile_context>

<pallas_src>
import math

import jax
import jax.numpy as jnp
from jax.experimental import pallas as pl
from jax.experimental.pallas import tpu as pltpu


def pe_add_kernel(x_ref, pe_ref, o_ref):
    """x_ref / o_ref: (tS, B*D) with batch folded into lanes; pe_ref: (tS, D)."""
    reps = x_ref.shape[1] // pe_ref.shape[1]
    pe = pe_ref[...]
    if reps > 1:
        # Replicate the positional rows across the folded batch along the lane
        # axis.  Lane-axis concatenation is cheap filler under the HBM DMA.
        pe = jnp.concatenate([pe] * reps, axis=-1)
    o_ref[...] = (x_ref[...] + pe).astype(o_ref.dtype)


def make_positional_encoding_table(d_model, max_len=5000, dtype=jnp.float32):
    """Sinusoidal table, same math as the PyTorch __init__, returned as (max_len, d_model)."""
    position = jnp.arange(0, max_len, dtype=jnp.float32)[:, None]            # (max_len, 1)
    div_term = jnp.exp(
        jnp.arange(0, d_model, 2, dtype=jnp.float32) * (-math.log(10000.0) / d_model)
    )                                                                          # (ceil(D/2),)
    pe = jnp.zeros((max_len, d_model), dtype=jnp.float32)
    pe = pe.at[:, 0::2].set(jnp.sin(position * div_term))
    pe = pe.at[:, 1::2].set(jnp.cos(position * div_term[: d_model // 2]))      # odd-D safe
    return pe.astype(dtype)


def positional_encoding_forward(x, pe_table, *, target_block_bytes=4 * 1024 * 1024):
    """x: (S, B, D); pe_table: (max_len, D) or (max_len, 1, D). Returns x + pe[:S].

    For in-place execution the caller should donate x (jax.jit donate_argnums);
    otherwise the input_output_aliases hint silently degrades to a copy.
    """
    S, B, D = x.shape
    if pe_table.ndim == 3:  # accept the PyTorch-style (max_len, 1, D) buffer
        pe_table = pe_table.reshape(pe_table.shape[0], pe_table.shape[-1])
    max_len, Dp = pe_table.shape
    assert Dp == D, "pe_table last dim must equal d_model"
    assert S <= max_len, f"seq_len {S} exceeds positional table max_len {max_len}"

    if pe_table.dtype != x.dtype:
        # Ideally done once at init (make_positional_encoding_table(dtype=x.dtype));
        # kept here so mixed-dtype callers stay correct without an f32 pe stream.
        pe_table = pe_table.astype(x.dtype)

    itemsize = jnp.dtype(x.dtype).itemsize
    total_bytes = S * B * D * itemsize
    lane_foldable = (B == 1) or (D % 128 == 0)
    # Early-out: decode / tiny inputs (launch + per-step overhead dominates), or
    # sub-128 d_model with B>1 (masked-lane stores) -> let XLA fuse the add.
    # TODO(synk): kernelize the B>1, d_model % 128 != 0 case (pad D or 3-D blocks).
    if S < 8 or total_bytes < (32 * 1024) or not lane_foldable:
        return x + pe_table[:S][:, None, :]

    x2 = x.reshape(S, B * D)  # free, contiguous: batch folded into the lane axis

    # Sequence-axis tile: ~target_block_bytes of x per step, multiple of 8 sublanes.
    bytes_per_seq_row = B * D * itemsize
    tS = max(8, target_block_bytes // bytes_per_seq_row)
    tS = min(tS, S)
    tS = max(8, (tS // 8) * 8)
    if pl.cdiv(S, tS) == 1 and S >= 16:
        # Give the v7x megacore (2 TensorCores) at least two parallel grid steps.
        tS = max(8, ((pl.cdiv(S, 2) + 7) // 8) * 8)
    grid = (pl.cdiv(S, tS),)

    # Explicit scoped-VMEM budget: in + out + pe blocks, double-buffered, + headroom.
    x_block_bytes = tS * B * D * itemsize
    pe_block_bytes = tS * D * itemsize
    vmem_needed = 2 * (2 * x_block_bytes + pe_block_bytes)
    vmem_limit = int(min(max(vmem_needed + (2 << 20), 16 << 20), 48 << 20))

    out2 = pl.pallas_call(
        pe_add_kernel,
        out_shape=jax.ShapeDtypeStruct((S, B * D), x.dtype),
        grid=grid,
        in_specs=[
            pl.BlockSpec((tS, B * D), lambda i: (i, 0)),  # x tile (batch folded in lanes)
            pl.BlockSpec((tS, D), lambda i: (i, 0)),      # matching rows of the pe table
        ],
        out_specs=pl.BlockSpec((tS, B * D), lambda i: (i, 0)),
        input_output_aliases={0: 0},  # in-place only if caller donates x
        compiler_params=pltpu.CompilerParams(
            dimension_semantics=("parallel",),
            vmem_limit_bytes=vmem_limit,
        ),
    )(x2, pe_table)
    return out2.reshape(S, B, D)


if __name__ == "__main__":
    MAX_LEN = 5000
    key = jax.random.PRNGKey(0)

    def check(S, B, D, dtype, tol):
        pe2 = make_positional_encoding_table(D, max_len=MAX_LEN, dtype=dtype)
        k = jax.random.fold_in(key, S * 1_000 + B * 100 + D)
        x = jax.random.normal(k, (S, B, D), dtype=dtype)
        out = jax.block_until_ready(positional_encoding_forward(x, pe2))
        ref = x + pe2[:S][:, None, :]
        assert out.shape == (S, B, D)
        assert out.dtype == x.dtype
        assert jnp.allclose(out, ref, atol=tol, rtol=tol), (S, B, D, dtype)

    # Pallas path: small chatbot-inference shapes, batch folded into lanes.
    check(128, 2, 128, jnp.float32, 1e-6)   # even 2-step grid (v7x megacore)
    check(100, 2, 128, jnp.float32, 1e-6)   # ragged S -> partial last block
    check(128, 1, 128, jnp.bfloat16, 1e-2)  # bf16 activations + bf16 pe stream
    # XLA early-out path: tiny decode-style input.
    check(4, 2, 32, jnp.float32, 1e-6)

    print("KERNEL_OK")
</pallas_src>

<mosaic_0001>
module attributes {stable_mosaic.version = 11 : i64} {
  func.func @pe_add_kernel(%arg0: i32, %arg1: memref<64x256xf32, #tpu.memory_space<vmem>>, %arg2: memref<64x128xf32, #tpu.memory_space<vmem>>, %arg3: memref<64x256xf32, #tpu.memory_space<vmem>>) attributes {dimension_semantics = [#tpu.dimension_semantics<parallel>], iteration_bounds = array<i64: 2>, scalar_prefetch = 0 : i64, scratch_operands = 0 : i64, tpu.core_type = #tpu.core_type<tc>, window_params = [{transform_indices = @transform_0, window_bounds = array<i64: 64, 256>}, {transform_indices = @transform_1, window_bounds = array<i64: 64, 128>}, {transform_indices = @transform_2, window_bounds = array<i64: 64, 256>}]} {
    %c0 = arith.constant 0 : index
    %c0_0 = arith.constant 0 : index
    %0 = vector.load %arg2[%c0, %c0_0] : memref<64x128xf32, #tpu.memory_space<vmem>>, vector<64x128xf32>
    %1 = tpu.concatenate %0, %0 in 1 : vector<64x128xf32>, vector<64x128xf32> -> vector<64x256xf32>
    %c0_1 = arith.constant 0 : index
    %c0_2 = arith.constant 0 : index
    %2 = vector.load %arg1[%c0_1, %c0_2] : memref<64x256xf32, #tpu.memory_space<vmem>>, vector<64x256xf32>
    %3 = arith.addf %2, %1 : vector<64x256xf32>
    %c0_3 = arith.constant 0 : index
    %c0_4 = arith.constant 0 : index
    %4 = vector.load %arg3[%c0_3, %c0_4] : memref<64x256xf32, #tpu.memory_space<vmem>>, vector<64x256xf32>
    tpu.vector_store %arg3[%c0_3, %c0_4], %3 {strides = array<i32>} : memref<64x256xf32, #tpu.memory_space<vmem>>, vector<64x256xf32>,
    return
  }
  func.func @transform_0(%arg0: i32) -> (i32, i32) {
    %c0_i32 = arith.constant 0 : i32
    %c0_i32_0 = arith.constant 0 : i32
    return %arg0, %c0_i32 : i32, i32
  }
  func.func @transform_1(%arg0: i32) -> (i32, i32) {
    %c0_i32 = arith.constant 0 : i32
    %c0_i32_0 = arith.constant 0 : i32
    return %arg0, %c0_i32 : i32, i32
  }
  func.func @transform_2(%arg0: i32) -> (i32, i32) {
    %c0_i32 = arith.constant 0 : i32
    %c0_i32_0 = arith.constant 0 : i32
    return %arg0, %c0_i32 : i32, i32
  }
}

</mosaic_0001>

<bundles_post_ra>
// kernel: tpu_custom_call.1
= control target key start
LH: loop header
LB: loop body
LE: loop exit
PB: predicated region body
PF: predicated region fallthrough
CT: control target
= control target key end

     0   :  { %7 = vsyncpa [#allocation3], 0  ;;  %s848_s0 = inlined_call_operand.hbm [shape: f32[128,256], index: 0, kind: input, shape index: {}, may-alias: {0,2}]   ;;  %s849_s1 = inlined_call_operand.hbm [shape: f32[5000,128], index: 1, kind: input, shape index: {}]   ;;  %s850_s2 = inlined_call_operand.hbm [shape: f32[128,256], index: 2, kind: output, shape index: {}, may-alias: {0,2}]  }
   0x1   :  { %9 = vsyncpa [#allocation3 + $0x1], 0 }
   0x2   :  { %10 = vsyncpa [#allocation6], 0 }
   0x3   :  { %12 = vsyncpa [#allocation6 + $0x1], 0 }
   0x4   :  { %13 = vsyncpa [#allocation4], 0 }
   0x5   :  { %15 = vsyncpa [#allocation4 + $0x1], 0  ;;  %s628_s9 = smov 0   ;;  %s630_s10 = smov 0  }
   0x6   :  { %s632_s11 = smov 0   ;;  %s634_s12 = smov 0  }
   0x7 LB: > { %s649_s13 = sadd.s32 4294967295, %s604_s12   ;;  %s390_s14 = sadd.s32 4294967294, %s604_s12   ;;  %s604_s12 = sphi %s634_s12, %s861_s12   ;;  %s600_s11 = sphi %s632_s11, %s860_s11   ;;  %s596_s10 = sphi %s630_s10, %s859_s10   ;;  %s592_s9 = sphi %s628_s9, %s858_s9  }
   0x8   : > { %s653_s15 = sadd.s32 1, %s604_s12   ;;  %s28_s16 = sadd.s32 1, %s600_s11 }
   0x9   : > { %s25_s17 = ssub.s32 %s604_s12, %s653_s15  ;;  %p35_p0 = scmp.ne.s32.totalorder %s600_s11, %s596_s10 }
   0xa   : > { %p26_p1 = scmp.eq.s32.totalorder %s25_s17, 0  ;;  %p36_p2 = scmp.eq.s32.totalorder %s604_s12, 0 }
   0xb   : > { %p41_p3 = scmp.ne.s32.totalorder %s596_s10, %s592_s9  ;;  %p42_p4 = scmp.eq.s32.totalorder %s649_s13, 0 }
   0xc   : > { %s665_s18 = scalar_select %p26_p1, %s600_s11, %s28_s16  }
   0xd   : > { %p667_p5 = por %p36_p2, %p35_p0  ;;  %p671_p6 = por %p42_p4, %p41_p3 }
   0xe   : > { %p91_p7 = scmp.eq.s32.totalorder %s649_s13, 1  ;;  %p97_p8 = scmp.eq.s32.totalorder %s390_s14, 1 }
   0xf   : > { %p851_p11 = scmp.ge.s32.totalorder %s604_s12, 2 }
  0x10   : > { %p676_p9 = por %p91_p7, %p35_p0  ;;  %p680_p10 = por %p97_p8, %p41_p3 }
  0x11   : > { %113 = sbr.rel (%p851_p11) target bundleno = 70 (0x46), region = 16  ;;  %s688_s23 = sand.u32 (!%p851_p11), 1, %s600_s11  }
  0x12   : > { %s415_s24 = sshll.u32 (!%p851_p11), %s604_s12, 7  ;;  %s393_s25 = sshll.u32 (!%p851_p11), %s688_s23, 7 }
  0x13   : > { %s127_s28 = scalar_lea.hbm (!%p851_p11), %s848_s0, %s415_s24  ;;  %s121_s30 = scalar_lea.vmem (!%p851_p11), [#allocation2], %s393_s25 }
  0x14   : > { %s128_s29 = sshll.u32 (!%p851_p11), %s127_s28, 4  ;;  %s130_s3 = sshll.u32 (!%p851_p11), %s121_s30, 4  ;;  %s129_s29 = int_to_ptr.hbm [resolvable:$true] %s128_s29  ;;  %s131_s3 = int_to_ptr.vmem [resolvable:$true] %s130_s3 }
  0x15   : > { %s118_s4 = scalar_lea.sflag (!%p851_p11), [#allocation3], %s688_s23  ;;  %s467_s5 = sshra.s32 (!%p851_p11), %s129_s29, 4  ;;  %s468_s5 = int_to_ptr.hbm [resolvable:$true] %s467_s5 }
  0x16   : > { %s469_s6 = scalar_lea.hbm %s468_s5, 128  ;;  %s473_s14 = scalar_lea.hbm %s848_s0, 256 }
  0x17   : > { %p470_p12 = scmp.ne.s32.totalorder %s468_s5, %s469_s6  ;;  %p474_p1 = scmp.lt.s32.totalorder %s468_s5, %s848_s0 }
  0x18   : > { %p475_p2 = scmp.lt.s32.totalorder %s473_s14, %s469_s6 }
  0x19   : > { %p471_p13 = pnand %p470_p12, %p667_p5 }
  0x1a   : > { %p476_p3 = por %p475_p2, %p474_p1 }
  0x1b   : > { %p472_p0 = pneg %p471_p13 }
  0x1d   : > { %p477_p4 = pnand %p476_p3, %p472_p0 }
  0x1f   : > { %480 = shalt.err (!%p477_p4)
}
  0x20   : > { %s606_s24 = smov 256   ;;  %s607_s25 = smov 16  }
  0x21   : > { %419 = dma.hbm_to_vmem [thread:$0]  (%p667_p5), %s129_s29, 2048, %s131_s3, %s118_s4, %s606_s24, %s606_s24, %s607_s25  }
  0x22   : > { %139 = sbr.rel (!%p667_p5) target bundleno = 70 (0x46), region = 24  ;;  %s397_s26 = sshll.u32 (%p667_p5), %s688_s23, 6 }
  0x23   : > { %s398_s27 = sshll.u32 (%p667_p5), %s604_s12, 3  ;;  %s141_s7 = scalar_lea.sflag (%p667_p5), [#allocation6], %s688_s23 }
  0x24   : > { %s146_s28 = ssub.s32 (%p667_p5), 625, %s398_s27  ;;  %s144_s8 = scalar_lea.vmem (%p667_p5), [#allocation5], %s397_s26 }
  0x25   : > { %p147_p7 = scmp.lt.s32.totalorder (%p667_p5), %s146_s28, 8 }
  0x27   : > { %s863_s28 = smov (!%p147_p7, %s146_s28), 8 }
  0x28   : > { %s399_s30 = sshll.u32 %s863_s28, 3 }
  0x29   : > { %s150_s5 = ssub.s32 64, %s399_s30 }
  0x2a   : > { %s151_s6 = sshll.u32 %s150_s5, 4 }
  0x2b   : > { %152 = vsyncadd %s141_s7, %s151_s6  ;;  %p716_p5 = scmp.ne.s32.totalorder %s399_s30, 0  ;;  %s416_s29 = sshll.u32 %s604_s12, 6 }
  0x2c   : > { %s155_s14 = scalar_lea.hbm %s849_s1, %s416_s29  ;;  %s159_s16 = sshll.u32 %s144_s8, 4  ;;  %s724_s16 = int_to_ptr.vmem [resolvable:$true] %s159_s16 }
  0x2d   : > { %s157_s17 = sshll.u32 %s155_s14, 4  ;;  %s403_s24 = sshll.u32 %s863_s28, 7  ;;  %s726_s17 = int_to_ptr.hbm [resolvable:$true] %s157_s17 }
  0x2e   : > { %s495_s25 = sshra.s32 %s726_s17, 4  ;;  %s497_s26 = sshrl.u32 %s403_s24, 4  ;;  %s496_s25 = int_to_ptr.hbm [resolvable:$true] %s495_s25 }
  0x2f   : > { %s502_s27 = scalar_lea.hbm %s496_s25, %s497_s26  ;;  %s506_s6 = scalar_lea.hbm %s849_s1, 5000 }
  0x30   : > { %p503_p8 = scmp.ne.s32.totalorder %s496_s25, %s502_s27  ;;  %p507_p0 = scmp.lt.s32.totalorder %s496_s25, %s849_s1 }
  0x31   : > { %p508_p1 = scmp.lt.s32.totalorder %s506_s6, %s502_s27 }
  0x32   : > { %p504_p12 = pnand %p503_p8, %p716_p5 }
  0x33   : > { %p509_p2 = por %p508_p1, %p507_p0 }
  0x34   : > { %p505_p13 = pneg %p504_p12 }
  0x36   : > { %p510_p3 = pnand %p509_p2, %p505_p13 }
  0x38   : > { %513 = shalt.err (!%p510_p3)
}
  0x39   : > { %s514_s3 = sshra.s32 %s724_s16, 4  ;;  %s608_s14 = smov [#allocation5]   ;;  %s515_s3 = int_to_ptr.vmem [resolvable:$true] %s514_s3 }
  0x3a   : > { %s521_s4 = scalar_lea.vmem %s515_s3, %s497_s26  ;;  %s525_s30 = scalar_lea.vmem %s608_s14, 128 }
  0x3b   : > { %p522_p4 = scmp.ne.s32.totalorder %s515_s3, %s521_s4  ;;  %p527_p12 = scmp.lt.s32.totalorder %s525_s30, %s521_s4 }
  0x3d   : > { %p523_p7 = pnand %p522_p4, %p716_p5 }
  0x3f   : > { %p524_p8 = pneg %p523_p7 }
  0x41   : > { %p529_p11 = pnand %p527_p12, %p524_p8 }
  0x43   : > { %532 = shalt.err (!%p529_p11)
}
  0x44   : > { %s609_s5 = smov 128   ;;  %s610_s25 = smov 8  }
  0x45   : > { %165 = dma.hbm_to_vmem [thread:$0]  (%p716_p5), %s726_s17, %s403_s24, %s724_s16, %s141_s7, %s609_s5, %s609_s5, %s610_s25  }
  0x46 PF: > { %p404_p13 = scmp.ge.s32.totalorder %s604_s12, 1  ;;  %p167_p0 = scmp.lt.s32.totalorder %s604_s12, 3 }
  0x48   : > { %p168_p1 = pnand %p404_p13, %p167_p0 }
  0x49   : > { %s754_s26 = sand.u32 (!%p168_p1), 1, %s596_s10  }
  0x4a   : > { %171 = sbr.rel (%p168_p1) target bundleno = 105 (0x69), region = 28  ;;  %s405_s27 = sshll.u32 (!%p168_p1), %s754_s26, 7 }
  0x4b   : > { %s174_s6 = scalar_lea.sflag (!%p168_p1), [#allocation3], %s754_s26  ;;  %s758_s19 = scalar_lea.vmem (!%p168_p1), [#allocation2], %s405_s27 }
  0x4f   : > { %579 = dma.done.wait (%p671_p6), %s174_s6, 2048  }
  0x50   : > { %581 = vsyncadd (%p671_p6), %s174_s6, 4294965248  ;;  %s406_s23 = sshll.u32 %s754_s26, 6  ;;  %s184_s28 = scalar_lea.sflag [#allocation6], %s754_s26 }
  0x51   : > { %s766_s7 = scalar_lea.vmem [#allocation5], %s406_s23 }
  0x52   : > { %583 = dma.done.wait (%p671_p6), %s184_s28, 1024  }
  0x53   : > { %585 = vsyncadd (%p671_p6), %s184_s28, 4294966272  ;;  %v221_v0 = vld [vmem:[%s766_s7] sm:$0xff]  ;;  %v230_v2 = vld [vmem:[%s758_s19 + $0x8] sm:$0xff]  ;;  %s781_s20 = scalar_lea.vmem [#allocation7], %s405_s27  ;;  %s418_s16 = sshll.u32 %s649_s13, 7 }
  0x54   : > { %v229_v1 = vld [vmem:[%s758_s19] sm:$0xff]  ;;  %v246_v4 = vadd.f32 %v230_v2, %v221_v0  ;;  %v222_v5 = vld [vmem:[%s766_s7 + $0x8] sm:$0xff]  ;;  %v231_v6 = vld [vmem:[%s758_s19 + $0x10] sm:$0xff]  ;;  %s290_s13 = scalar_lea.hbm %s850_s2, %s418_s16  ;;  %s291_s8 = sshll.u32 %s781_s20, 4  ;;  %s292_s8 = int_to_ptr.vmem [resolvable:$true] %s291_s8 }
  0x55   : > { %v245_v3 = vadd.f32 %v229_v1, %v221_v0  ;;  %v232_v7 = vld [vmem:[%s758_s19 + $0x18] sm:$0xff]  ;;  %v247_v8 = vadd.f32 %v231_v6, %v222_v5  ;;  %v223_v10 = vld [vmem:[%s766_s7 + $0x10] sm:$0xff]  ;;  %v233_v11 = vld [vmem:[%s758_s19 + $0x20] sm:$0xff]  ;;  %s293_s29 = sshll.u32 %s290_s13, 4  ;;  %s278_s3 = scalar_lea.sflag [#allocation4], %s754_s26  ;;  %s294_s29 = int_to_ptr.hbm [resolvable:$true] %s293_s29 }
  0x56   : > { %v248_v9 = vadd.f32 %v232_v7, %v222_v5  ;;  %v234_v12 = vld [vmem:[%s758_s19 + $0x28] sm:$0xff]  ;;  %v249_v13 = vadd.f32 %v233_v11, %v223_v10  ;;  %v224_v14 = vld [vmem:[%s766_s7 + $0x18] sm:$0xff]  ;;  %v235_v15 = vld [vmem:[%s758_s19 + $0x30] sm:$0xff]  ;;  %262 = vst [vmem:[%s781_s20 + $0x8] sm:$0xff] %v246_v4  ;;  %s548_s4 = sshra.s32 %s294_s29, 4  ;;  %s554_s25 = scalar_lea.hbm %s850_s2, 256  ;;  %s549_s4 = int_to_ptr.hbm [resolvable:$true] %s548_s4 }
  0x57   : > { %261 = vst [vmem:[%s781_s20] sm:$0xff] %v245_v3  ;;  %v236_v16 = vld [vmem:[%s758_s19 + $0x38] sm:$0xff]  ;;  %v250_v17 = vadd.f32 %v234_v12, %v223_v10  ;;  %v225_v18 = vld [vmem:[%s766_s7 + $0x20] sm:$0xff]  ;;  %v251_v20 = vadd.f32 %v235_v15, %v224_v14  ;;  %v238_v21 = vld [vmem:[%s758_s19 + $0x48] sm:$0xff]  ;;  %s550_s14 = scalar_lea.hbm %s549_s4, 128  ;;  %p555_p2 = scmp.lt.s32.totalorder %s549_s4, %s850_s2 }
  0x58   : > { %v237_v19 = vld [vmem:[%s758_s19 + $0x40] sm:$0xff]  ;;  %263 = vst [vmem:[%s781_s20 + $0x10] sm:$0xff] %v247_v8  ;;  %v252_v22 = vadd.f32 %v236_v16, %v224_v14  ;;  %v226_v23 = vld [vmem:[%s766_s7 + $0x28] sm:$0xff]  ;;  %v239_v24 = vld [vmem:[%s758_s19 + $0x50] sm:$0xff]  ;;  %v254_v27 = vadd.f32 %v238_v21, %v225_v18  ;;  %p551_p6 = scmp.ne.s32.totalorder %s549_s4, %s550_s14  ;;  %p556_p3 = scmp.lt.s32.totalorder %s554_s25, %s550_s14 }
  0x59   : > { %264 = vst [vmem:[%s781_s20 + $0x18] sm:$0xff] %v248_v9  ;;  %v253_v25 = vadd.f32 %v237_v19, %v225_v18  ;;  %v240_v26 = vld [vmem:[%s758_s19 + $0x58] sm:$0xff]  ;;  %v227_v28 = vld [vmem:[%s766_s7 + $0x30] sm:$0xff]  ;;  %v241_v29 = vld [vmem:[%s758_s19 + $0x60] sm:$0xff]  ;;  %v255_v30 = vadd.f32 %v239_v24, %v226_v23 }
  0x5a   : > { %265 = vst [vmem:[%s781_s20 + $0x20] sm:$0xff] %v249_v13  ;;  %v242_v31 = vld [vmem:[%s758_s19 + $0x68] sm:$0xff]  ;;  %v256_v32 = vadd.f32 %v240_v26, %v226_v23  ;;  %v228_v33 = vld [vmem:[%s766_s7 + $0x38] sm:$0xff]  ;;  %v243_v34 = vld [vmem:[%s758_s19 + $0x70] sm:$0xff]  ;;  %v257_v35 = vadd.f32 %v241_v29, %v227_v28  ;;  %p552_p11 = pnand %p551_p6, %p676_p9  ;;  %p557_p4 = por %p556_p3, %p555_p2 }
  0x5b   : > { %266 = vst [vmem:[%s781_s20 + $0x28] sm:$0xff] %v250_v17  ;;  %v244_v36 = vld [vmem:[%s758_s19 + $0x78] sm:$0xff]  ;;  %v258_v37 = vadd.f32 %v242_v31, %v227_v28  ;;  %v259_v38 = vadd.f32 %v243_v34, %v228_v33 }
  0x5c   : > { %267 = vst [vmem:[%s781_s20 + $0x30] sm:$0xff] %v251_v20  ;;  %v260_v39 = vadd.f32 %v244_v36, %v228_v33  ;;  %p553_p5 = pneg %p552_p11 }
  0x5d   : > { %268 = vst [vmem:[%s781_s20 + $0x38] sm:$0xff] %v252_v22 }
  0x5e   : > { %269 = vst [vmem:[%s781_s20 + $0x40] sm:$0xff] %v253_v25  ;;  %p558_p7 = pnand %p557_p4, %p553_p5 }
  0x5f   : > { %270 = vst [vmem:[%s781_s20 + $0x48] sm:$0xff] %v254_v27 }
  0x60   : > { %271 = vst [vmem:[%s781_s20 + $0x50] sm:$0xff] %v255_v30 }
  0x61   : > { %272 = vst [vmem:[%s781_s20 + $0x58] sm:$0xff] %v256_v32 }
  0x62   : > { %273 = vst [vmem:[%s781_s20 + $0x60] sm:$0xff] %v257_v35 }
  0x63   : > { %274 = vst [vmem:[%s781_s20 + $0x68] sm:$0xff] %v258_v37 }
  0x64   : > { %275 = vst [vmem:[%s781_s20 + $0x70] sm:$0xff] %v259_v38 }
  0x65   : > { %276 = vst [vmem:[%s781_s20 + $0x78] sm:$0xff] %v260_v39 }
  0x66   : > { %561 = shalt.err (!%p558_p7)
}
  0x67   : > { %s611_s26 = smov 256   ;;  %s612_s19 = smov 16  }
  0x68   : > { %422 = dma.vmem_to_hbm [thread:$0]  (%p676_p9), %s292_s8, 2048, %s294_s29, %s278_s3, %s611_s26, %s611_s26, %s612_s19  }
  0x69 PF: > { %s308_s23 = sand.u32 1, %s592_s9   ;;  %p857_p8 = scmp.ge.s32.totalorder %s604_s12, 2 }
  0x6a   : > { %s309_s28 = scalar_lea.sflag [#allocation4], %s308_s23 }
  0x6b   : > { %p425_p12 = pnand %p857_p8, %p680_p10 }
  0x6d   : > { %p426_p13 = pneg %p425_p12 }
  0x6f   : > { %587 = dma.done.wait (%p426_p13), %s309_s28, 2048  }
  0x70   : > { %589 = vsyncadd (%p426_p13), %s309_s28, 4294965248  ;;  %p18_p0 = scmp.ge.s32.totalorder %s653_s15, 4   ;;  %s858_s9 = smov %s596_s10 }
  0x71   : > { %s859_s10 = smov %s600_s11  ;;  %s860_s11 = smov %s665_s18 }
  0x72   : > { %s861_s12 = smov %s653_s15  ;;  %20 = sbr.rel (!%p18_p0) target bundleno = 7 (0x7), region = 86 }
  0x77   :  { %315 = vsyncpa [#allocation3], 1 }
  0x78   :  { %317 = vsyncpa [#allocation3 + $0x1], 1 }
  0x79   :  { %318 = vsyncpa [#allocation6], 1 }
  0x7a   :  { %320 = vsyncpa [#allocation6 + $0x1], 1 }
  0x7b   :  { %321 = vsyncpa [#allocation4], 1 }
  0x7c   :  { %323 = vsyncpa [#allocation4 + $0x1], 1 }

</bundles_post_ra>
